<compile_context>
chip_gen: v7x
topology: tpu7x:2x2x1
jax: 0.10.0
libtpu: 0.0.40
codegen_flags: <defaults>
</compile_context>

<pallas_src>
import functools

import jax
import jax.numpy as jnp
from jax import lax
from jax.experimental import pallas as pl
from jax.experimental.pallas import tpu as pltpu


# ----------------------------------------------------------------------------- helpers
def _pick_tile(m, target=256):
    """Largest divisor of m that is <= target and sublane-aligned (or m itself)."""
    t = min(m, target)
    for cand in range(t, 0, -1):
        if m % cand == 0 and (cand % 8 == 0 or cand == m):
            return cand
    return m


def _full_spec(a):
    zeros = (0,) * a.ndim
    return pl.BlockSpec(a.shape, lambda i, z=zeros: z)


_PARALLEL_1D = pltpu.CompilerParams(dimension_semantics=("parallel",))


# ----------------------------------------------------------------------------- encoders
def _linear_kernel(x_ref, w_ref, b_ref, o_ref, *, act):
    y = jnp.dot(x_ref[...], w_ref[...], preferred_element_type=jnp.float32)
    y = y + b_ref[...]
    if act == "relu":
        y = jnp.maximum(y, 0.0)
    elif act == "tanh":
        y = jnp.tanh(y)
    o_ref[...] = y.astype(o_ref.dtype)


def linear(x, w, b, act="none", out_dtype=jnp.float32, tile=256):
    M, K = x.shape
    N = w.shape[1]
    b2 = b.reshape(1, N)
    tm = _pick_tile(M, tile)
    return pl.pallas_call(
        functools.partial(_linear_kernel, act=act),
        grid=(M // tm,),
        in_specs=[pl.BlockSpec((tm, K), lambda i: (i, 0)),
                  pl.BlockSpec((K, N), lambda i: (0, 0)),
                  pl.BlockSpec((1, N), lambda i: (0, 0))],
        out_specs=pl.BlockSpec((tm, N), lambda i: (i, 0)),
        out_shape=jax.ShapeDtypeStruct((M, N), out_dtype),
        compiler_params=_PARALLEL_1D,
    )(x, w, b2)


def _cnet_kernel(x_ref, w_ref, b_ref, net_ref, inp_ref):
    # fused context encoder: matmul + split + tanh/relu (no HBM round trip)
    y = jnp.dot(x_ref[...], w_ref[...], preferred_element_type=jnp.float32)
    y = y + b_ref[...]
    hdim = net_ref.shape[1]
    net_ref[...] = jnp.tanh(y[:, :hdim]).astype(net_ref.dtype)
    inp_ref[...] = jnp.maximum(y[:, hdim:], 0.0).astype(inp_ref.dtype)


def encode_context(x, w, b, tile=256):
    M, K = x.shape
    N = w.shape[1]
    hdim = N // 2
    tm = _pick_tile(M, tile)
    return pl.pallas_call(
        _cnet_kernel,
        grid=(M // tm,),
        in_specs=[pl.BlockSpec((tm, K), lambda i: (i, 0)),
                  pl.BlockSpec((K, N), lambda i: (0, 0)),
                  pl.BlockSpec((1, N), lambda i: (0, 0))],
        out_specs=(pl.BlockSpec((tm, hdim), lambda i: (i, 0)),
                   pl.BlockSpec((tm, hdim), lambda i: (i, 0))),
        out_shape=(jax.ShapeDtypeStruct((M, hdim), jnp.float32),     # net (f32 state)
                   jax.ShapeDtypeStruct((M, hdim), jnp.bfloat16)),   # inp (matmul operand)
        compiler_params=_PARALLEL_1D,
    )(x, w, b.reshape(1, N))


# ----------------------------------------------------------------------------- correlation
def _corr_mm_kernel(f1_ref, f2_ref, c_ref, stats_ref, acc_ref, *, scale, inv_count):
    # pass 1: tiled all-pairs matmul + global sum / sum-of-squares accumulation
    i = pl.program_id(1)
    col = lax.broadcasted_iota(jnp.int32, (1, 128), 1)

    @pl.when(i == 0)
    def _():
        acc_ref[...] = jnp.zeros_like(acc_ref)

    c = lax.dot_general(f1_ref[...], f2_ref[...],
                        dimension_numbers=(((1,), (1,)), ((), ())),
                        preferred_element_type=jnp.float32) * scale
    c_ref[...] = c
    s = jnp.sum(c)
    ss = jnp.sum(c * c)
    acc_ref[...] += jnp.where(col == 0, s, 0.0) + jnp.where(col == 1, ss, 0.0)

    @pl.when(i == pl.num_programs(1) - 1)
    def _():
        acc = acc_ref[...]
        tot = jnp.sum(jnp.where(col == 0, acc, 0.0))
        tot2 = jnp.sum(jnp.where(col == 1, acc, 0.0))
        mu = tot * inv_count
        var = jnp.maximum(tot2 * inv_count - mu * mu, 0.0)
        inv_sig = lax.rsqrt(var + 1e-6)
        stats_ref[...] = (jnp.where(col == 0, mu, 0.0)
                          + jnp.where(col == 1, inv_sig, 0.0))


def _corr_norm_kernel(c_ref, stats_ref, o_ref):
    # pass 2: tiled global normalization
    st = stats_ref[...]
    col = lax.broadcasted_iota(jnp.int32, (1, 128), 1)
    mu = jnp.sum(jnp.where(col == 0, st, 0.0))
    inv_sig = jnp.sum(jnp.where(col == 1, st, 0.0))
    o_ref[...] = (c_ref[...] - mu) * inv_sig


def all_pairs_corr(f1, f2):
    # f1, f2: (N, HW, C) bf16 -> globally-normalized correlation (N, HW, HW) f32
    Nb, HW, C = f1.shape
    tm = _pick_tile(HW, 256)
    nt = HW // tm
    params = pltpu.CompilerParams(
        dimension_semantics=("parallel", "arbitrary"),
        vmem_limit_bytes=32 * 1024 * 1024)
    raw, stats = pl.pallas_call(
        functools.partial(_corr_mm_kernel,
                          scale=1.0 / (C ** 0.5),
                          inv_count=1.0 / float(HW * HW)),
        grid=(Nb, nt),
        in_specs=[pl.BlockSpec((None, tm, C), lambda b, i: (b, i, 0)),
                  pl.BlockSpec((None, HW, C), lambda b, i: (b, 0, 0))],
        out_specs=(pl.BlockSpec((None, tm, HW), lambda b, i: (b, i, 0)),
                   pl.BlockSpec((None, 1, 128), lambda b, i: (b, 0, 0))),
        out_shape=(jax.ShapeDtypeStruct((Nb, HW, HW), jnp.float32),
                   jax.ShapeDtypeStruct((Nb, 1, 128), jnp.float32)),
        scratch_shapes=[pltpu.VMEM((1, 128), jnp.float32)],
        compiler_params=params,
    )(f1, f2)

    return pl.pallas_call(
        _corr_norm_kernel,
        grid=(Nb, nt),
        in_specs=[pl.BlockSpec((None, tm, HW), lambda b, i: (b, i, 0)),
                  pl.BlockSpec((None, 1, 128), lambda b, i: (b, 0, 0))],
        out_specs=pl.BlockSpec((None, tm, HW), lambda b, i: (b, i, 0)),
        out_shape=jax.ShapeDtypeStruct((Nb, HW, HW), jnp.float32),
        compiler_params=pltpu.CompilerParams(
            dimension_semantics=("parallel", "parallel"),
            vmem_limit_bytes=32 * 1024 * 1024),
    )(raw, stats)


# ----------------------------------------------------------------------------- update block
def _update_kernel(net_ref, inp_ref, cfeat_ref, flow_ref,
                   menc_w, menc_b,
                   wx_inp, wx_menc, wx_flow, bx,
                   wh_zr, wqh,
                   fh1_w, fh1_b, fh2_w, fh2_b,
                   mh1_w, mh1_b, mh2_w, mh2_b,
                   net_out, delta_out, mask_out):
    f32 = jnp.float32
    bf16 = jnp.bfloat16

    h = net_ref[...]                                   # (T, 128) f32
    h_bf = h.astype(bf16)
    inp = inp_ref[...]                                 # (T, 128) bf16
    cfeat = cfeat_ref[...]                             # (T, 324) bf16
    flow = flow_ref[...]                               # (T, 2)   f32

    # motion encoder (1x1): relu(corr_feat @ W + b)
    mfeat = jnp.maximum(
        jnp.dot(cfeat, menc_w[...], preferred_element_type=f32) + menc_b[...], 0.0)
    mfeat_bf = mfeat.astype(bf16)

    # GRU input projection x @ Wx with x = [inp | mfeat | flow]; Wx pre-split by input
    # (no per-iteration concat).  384 = [z | r | q] fused on the output dim.
    wxf = wx_flow[...]                                 # (2, 384) f32, tiny -> VPU
    xzrq = (jnp.dot(inp, wx_inp[...], preferred_element_type=f32)
            + jnp.dot(mfeat_bf, wx_menc[...], preferred_element_type=f32)
            + flow[:, 0:1] * wxf[0:1, :]
            + flow[:, 1:2] * wxf[1:2, :]
            + bx[...])                                 # (T, 384)

    # fused hidden projection for z|r gates
    hzr = jnp.dot(h_bf, wh_zr[...], preferred_element_type=f32)       # (T, 256)
    z = jax.nn.sigmoid(hzr[:, :128] + xzrq[:, :128])
    r = jax.nn.sigmoid(hzr[:, 128:] + xzrq[:, 128:256])
    rh = (r * h).astype(bf16)
    q = jnp.tanh(jnp.dot(rh, wqh[...], preferred_element_type=f32) + xzrq[:, 256:])
    h_new = (1.0 - z) * h + z * q                       # (T, 128) f32
    net_out[...] = h_new

    # flow head + mask head (0.25 mask scale folded into mh2 weights at init)
    h_new_bf = h_new.astype(bf16)
    fh = jnp.maximum(
        jnp.dot(h_new_bf, fh1_w[...], preferred_element_type=f32) + fh1_b[...], 0.0)
    delta_out[...] = (jnp.dot(fh.astype(bf16), fh2_w[...],
                              preferred_element_type=f32) + fh2_b[...])
    mh = jnp.maximum(
        jnp.dot(h_new_bf, mh1_w[...], preferred_element_type=f32) + mh1_b[...], 0.0)
    mask_out[...] = (jnp.dot(mh.astype(bf16), mh2_w[...],
                             preferred_element_type=f32) + mh2_b[...])


def update_block(net, inp, cfeat, flow, p):
    R = net.shape[0]
    tm = _pick_tile(R, 256)
    weights = [p['menc_w'], p['menc_b'],
               p['wx_inp'], p['wx_menc'], p['wx_flow'], p['bx'],
               p['wh_zr'], p['wqh'],
               p['fh1_w'], p['fh1_b'], p['fh2_w'], p['fh2_b'],
               p['mh1_w'], p['mh1_b'], p['mh2_w'], p['mh2_b']]
    in_specs = ([pl.BlockSpec((tm, 128), lambda i: (i, 0)),
                 pl.BlockSpec((tm, 128), lambda i: (i, 0)),
                 pl.BlockSpec((tm, 324), lambda i: (i, 0)),
                 pl.BlockSpec((tm, 2), lambda i: (i, 0))]
                + [_full_spec(a) for a in weights])
    out_specs = (pl.BlockSpec((tm, 128), lambda i: (i, 0)),
                 pl.BlockSpec((tm, 2), lambda i: (i, 0)),
                 pl.BlockSpec((tm, 576), lambda i: (i, 0)))
    return pl.pallas_call(
        _update_kernel,
        grid=(R // tm,),
        in_specs=in_specs,
        out_specs=out_specs,
        out_shape=(jax.ShapeDtypeStruct((R, 128), jnp.float32),
                   jax.ShapeDtypeStruct((R, 2), jnp.float32),
                   jax.ShapeDtypeStruct((R, 576), jnp.float32)),
        compiler_params=_PARALLEL_1D,
    )(net, inp, cfeat, flow, *weights)


# ----------------------------------------------------------------------------- upsample
def _upsample_kernel(mask_ref, ufx_ref, ufy_ref, o_ref):
    # convex combination: softmax over the 9 neighbors, weighted sum of unfolded flow
    # lane-dense layout: mask (T, 9*64) in, [ox | oy] (T, 128) out
    m = mask_ref[...]                                  # (T, 576) f32, ch = k*64 + dy*8 + dx
    chunks = [m[:, 64 * k:64 * (k + 1)] for k in range(9)]
    mx = chunks[0]
    for c in chunks[1:]:
        mx = jnp.maximum(mx, c)
    exps = [jnp.exp(c - mx) for c in chunks]
    denom = exps[0]
    for e in exps[1:]:
        denom = denom + e
    inv = 1.0 / denom
    ufx = ufx_ref[...]                                 # (T, 9)
    ufy = ufy_ref[...]
    ox = jnp.zeros_like(mx)
    oy = jnp.zeros_like(mx)
    for k in range(9):
        pk = exps[k] * inv
        ox = ox + pk * ufx[:, k:k + 1]
        oy = oy + pk * ufy[:, k:k + 1]
    o_ref[...] = jnp.concatenate([ox, oy], axis=-1)    # (T, 128)


def unfold3x3(flow_nhwc):
    # (N, H, W, 2) -> (N*H*W, 9, 2), zero padded (F.unfold with padding=1)
    N, H, W, C = flow_nhwc.shape
    fp = jnp.pad(flow_nhwc, ((0, 0), (1, 1), (1, 1), (0, 0)))
    patches = [fp[:, dy:dy + H, dx:dx + W, :] for dy in range(3) for dx in range(3)]
    uf = jnp.stack(patches, axis=3)                    # (N, H, W, 9, 2)
    return uf.reshape(N * H * W, 9, 2)


def upsample_flow(flow_nhwc, mask_rows, N, H, W):
    # flow_nhwc: (N, H, W, 2); mask_rows: (N*H*W, 576) -> (N, 2, 8H, 8W)
    R = N * H * W
    uf = unfold3x3(8.0 * flow_nhwc)                    # (R, 9, 2), no 64x repeat
    ufx = uf[:, :, 0]
    ufy = uf[:, :, 1]
    tm = _pick_tile(R, 512)
    out = pl.pallas_call(
        _upsample_kernel,
        grid=(R // tm,),
        in_specs=[pl.BlockSpec((tm, 576), lambda i: (i, 0)),
                  pl.BlockSpec((tm, 9), lambda i: (i, 0)),
                  pl.BlockSpec((tm, 9), lambda i: (i, 0))],
        out_specs=pl.BlockSpec((tm, 128), lambda i: (i, 0)),
        out_shape=jax.ShapeDtypeStruct((R, 128), jnp.float32),
        compiler_params=_PARALLEL_1D,
    )(mask_rows, ufx, ufy)
    # final 8x8 interleave done in the JAX wrapper (cheap metadata ops)
    ox = out[:, :64].reshape(N, H, W, 8, 8)
    oy = out[:, 64:].reshape(N, H, W, 8, 8)
    up = jnp.stack([ox, oy], axis=1)                   # (N, 2, H, W, 8, 8)
    up = up.transpose(0, 1, 2, 4, 3, 5).reshape(N, 2, 8 * H, 8 * W)
    return up


# ----------------------------------------------------------------------------- glue (JAX)
def bilinear_sample(img, x, y):
    # img: (B, H, W); x, y: (B, P); zero padding outside (like grid_sample zeros)
    B, H, W = img.shape
    x0 = jnp.floor(x)
    y0 = jnp.floor(y)
    x1 = x0 + 1.0
    y1 = y0 + 1.0
    wx1 = x - x0
    wx0 = 1.0 - wx1
    wy1 = y - y0
    wy0 = 1.0 - wy1
    flat = img.reshape(B, H * W)

    def gather(xi, yi):
        valid = (xi >= 0) & (xi <= W - 1) & (yi >= 0) & (yi <= H - 1)
        xi_c = jnp.clip(xi, 0, W - 1).astype(jnp.int32)
        yi_c = jnp.clip(yi, 0, H - 1).astype(jnp.int32)
        vals = jnp.take_along_axis(flat, yi_c * W + xi_c, axis=1)
        return jnp.where(valid, vals, 0.0)

    return (gather(x0, y0) * wx0 * wy0 + gather(x1, y0) * wx1 * wy0 +
            gather(x0, y1) * wx0 * wy1 + gather(x1, y1) * wx1 * wy1)


def corr_lookup(corr, coords, num_levels=4, radius=4):
    # corr: (N, HW1, H2, W2); coords: (N, H1, W1, 2) -> (N*H1*W1, num_levels*(2r+1)^2)
    # TODO(synk): gather-based bilinear lookup stays in JAX glue (no clean Pallas gather).
    N, HW1, H2, W2 = corr.shape
    B = N * HW1
    corr_l = corr.reshape(B, H2, W2)
    d = jnp.arange(-radius, radius + 1, dtype=jnp.float32)
    dyg, dxg = jnp.meshgrid(d, d, indexing='ij')
    dxs = dxg.reshape(-1)
    dys = dyg.reshape(-1)
    cx = coords[..., 0].reshape(B)
    cy = coords[..., 1].reshape(B)
    feats = []
    for lvl in range(num_levels):
        scale = float(2 ** lvl)
        x = cx[:, None] / scale + dxs[None, :]
        y = cy[:, None] / scale + dys[None, :]
        feats.append(bilinear_sample(corr_l, x, y))
        if lvl < num_levels - 1:
            Hc, Wc = corr_l.shape[1], corr_l.shape[2]
            corr_l = corr_l.reshape(B, Hc // 2, 2, Wc // 2, 2).mean(axis=(2, 4))
    return jnp.concatenate(feats, axis=1)


# ----------------------------------------------------------------------------- params
def init_params(key):
    keys = jax.random.split(key, 16)

    def w(k, shape, scale=1.0, dtype=jnp.bfloat16):
        v = jax.random.normal(k, shape, jnp.float32) * (scale / (shape[0] ** 0.5))
        return v.astype(dtype)

    z = lambda shape: jnp.zeros(shape, jnp.float32)

    p = {}
    # stride-8 patch-embed encoders (weights in bf16, biases in f32)
    p['fnet_w'] = w(keys[0], (192, 256)); p['fnet_b'] = z((1, 256))
    p['cnet_w'] = w(keys[1], (192, 256)); p['cnet_b'] = z((1, 256))
    # motion encoder (1x1)
    p['menc_w'] = w(keys[2], (324, 126)); p['menc_b'] = z((1, 126))
    # ConvGRU with fused gate weights: Wx split by input part, 384 = [z|r|q]
    p['wx_inp'] = w(keys[3], (128, 384))
    p['wx_menc'] = w(keys[4], (126, 384))
    p['wx_flow'] = w(keys[5], (2, 384), dtype=jnp.float32)   # tiny -> VPU path
    p['bx'] = z((1, 384))
    p['wh_zr'] = w(keys[6], (128, 256))                      # [z|r] hidden weights
    p['wqh'] = w(keys[7], (128, 128))
    # flow head
    p['fh1_w'] = w(keys[8], (128, 256)); p['fh1_b'] = z((1, 256))
    p['fh2_w'] = w(keys[9], (256, 2), scale=0.1); p['fh2_b'] = z((1, 2))
    # mask head (0.25 scale folded into the last layer)
    p['mh1_w'] = w(keys[10], (128, 256)); p['mh1_b'] = z((1, 256))
    p['mh2_w'] = w(keys[11], (256, 576), scale=0.25); p['mh2_b'] = z((1, 576))
    return p


# ----------------------------------------------------------------------------- forward
def craft_forward(params, image1, image2, iters=12):
    N, _, H, W = image1.shape
    h8, w8 = H // 8, W // 8
    HW = h8 * w8
    R = N * HW

    def patchify(img):
        x = 2.0 * (img / 255.0) - 1.0
        x = jnp.transpose(x, (0, 2, 3, 1))                      # NCHW -> NHWC
        x = x.reshape(N, h8, 8, w8, 8, 3)
        x = x.transpose(0, 1, 3, 2, 4, 5).reshape(R, 8 * 8 * 3)
        return x.astype(jnp.bfloat16)

    x1 = patchify(image1)
    x2 = patchify(image2)

    # feature / context encoders (row-tiled Pallas matmul kernels)
    fmap1 = linear(x1, params['fnet_w'], params['fnet_b'], out_dtype=jnp.bfloat16)
    fmap2 = linear(x2, params['fnet_w'], params['fnet_b'], out_dtype=jnp.bfloat16)
    net, inp = encode_context(x1, params['cnet_w'], params['cnet_b'])

    # correlation volume (tiled matmul + global normalization, 2-pass Pallas)
    corr_vol = all_pairs_corr(fmap1.reshape(N, HW, 256),
                              fmap2.reshape(N, HW, 256)).reshape(N, HW, h8, w8)

    # initialize_flow: coordinate grids (x, y)
    ys, xs = jnp.meshgrid(jnp.arange(h8, dtype=jnp.float32),
                          jnp.arange(w8, dtype=jnp.float32), indexing='ij')
    coords0 = jnp.broadcast_to(jnp.stack([xs, ys], axis=-1), (N, h8, w8, 2))
    coords1 = coords0

    flow_predictions = []
    for _ in range(iters):
        corr_feat = corr_lookup(corr_vol, coords1, num_levels=4, radius=4)
        corr_feat = corr_feat.astype(jnp.bfloat16)               # (R, 324)
        flow = (coords1 - coords0).reshape(R, 2)

        # fused update block: motion encoder + ConvGRU + flow/mask heads
        net, delta, mask = update_block(net, inp, corr_feat, flow, params)

        coords1 = coords1 + delta.reshape(N, h8, w8, 2)
        flow_up = upsample_flow(coords1 - coords0, mask, N, h8, w8)
        flow_predictions.append(flow_up)

    return flow_predictions


# ----------------------------------------------------------------------------- main
if __name__ == "__main__":
    key = jax.random.PRNGKey(0)
    k1, k2 = jax.random.split(key)
    N, C, H, W = 2, 3, 64, 64
    image1 = jax.random.uniform(k1, (N, C, H, W), jnp.float32, 0.0, 255.0)
    image2 = jax.random.uniform(k2, (N, C, H, W), jnp.float32, 0.0, 255.0)

    params = init_params(jax.random.PRNGKey(42))
    flow_predictions = craft_forward(params, image1, image2, iters=3)
    flow_up = jax.block_until_ready(flow_predictions[-1])

    assert flow_up.shape == (N, 2, H, W), flow_up.shape
    assert bool(jnp.all(jnp.isfinite(flow_up)))
    print("KERNEL_OK")
</pallas_src>

<mosaic_0001>
module attributes {stable_mosaic.version = 11 : i64} {
  func.func @_linear_kernel(%arg0: i32, %arg1: memref<128x192xbf16, #tpu.memory_space<vmem>>, %arg2: memref<192x256xbf16, #tpu.memory_space<vmem>>, %arg3: memref<1x256xf32, #tpu.memory_space<vmem>>, %arg4: memref<128x256xbf16, #tpu.memory_space<vmem>>) attributes {dimension_semantics = [#tpu.dimension_semantics<parallel>], iteration_bounds = array<i64: 1>, scalar_prefetch = 0 : i64, scratch_operands = 0 : i64, tpu.core_type = #tpu.core_type<tc>, window_params = [{transform_indices = @transform_0, window_bounds = array<i64: 128, 192>}, {pipeline_mode = #tpu.pipeline_mode<synchronous>, transform_indices = @transform_1, window_bounds = array<i64: 192, 256>}, {pipeline_mode = #tpu.pipeline_mode<synchronous>, transform_indices = @transform_2, window_bounds = array<i64: 1, 256>}, {transform_indices = @transform_3, window_bounds = array<i64: 128, 256>}]} {
    %c0 = arith.constant 0 : index
    %c0_0 = arith.constant 0 : index
    %0 = vector.load %arg1[%c0, %c0_0] : memref<128x192xbf16, #tpu.memory_space<vmem>>, vector<128x192xbf16>
    %c0_1 = arith.constant 0 : index
    %c0_2 = arith.constant 0 : index
    %1 = vector.load %arg2[%c0_1, %c0_2] : memref<192x256xbf16, #tpu.memory_space<vmem>>, vector<192x256xbf16>
    %cst = arith.constant dense<0.000000e+00> : vector<128x256xf32>
    %2 = tpu.matmul %0, %1, %cst {dimension_numbers = #tpu.dot_dimension_numbers<[1], [0], [0], [1], [0, 0, 1, 1], [], []>} : vector<128x192xbf16>, vector<192x256xbf16>, vector<128x256xf32> -> vector<128x256xf32>
    %c0_3 = arith.constant 0 : index
    %c0_4 = arith.constant 0 : index
    %3 = vector.load %arg3[%c0_3, %c0_4] : memref<1x256xf32, #tpu.memory_space<vmem>>, vector<1x256xf32>
    %4 = vector.broadcast %3 : vector<1x256xf32> to vector<128x256xf32>
    %5 = arith.addf %2, %4 : vector<128x256xf32>
    %6 = arith.truncf %5 : vector<128x256xf32> to vector<128x256xbf16>
    %c0_5 = arith.constant 0 : index
    %c0_6 = arith.constant 0 : index
    %7 = vector.load %arg4[%c0_5, %c0_6] : memref<128x256xbf16, #tpu.memory_space<vmem>>, vector<128x256xbf16>
    tpu.vector_store %arg4[%c0_5, %c0_6], %6 {strides = array<i32>} : memref<128x256xbf16, #tpu.memory_space<vmem>>, vector<128x256xbf16>,
    return
  }
  func.func @transform_0(%arg0: i32) -> (i32, i32) {
    %c0_i32 = arith.constant 0 : i32
    %c0_i32_0 = arith.constant 0 : i32
    return %arg0, %c0_i32 : i32, i32
  }
  func.func @transform_1(%arg0: i32) -> (i32, i32) {
    %c0_i32 = arith.constant 0 : i32
    %c0_i32_0 = arith.constant 0 : i32
    %c0_i32_1 = arith.constant 0 : i32
    return %c0_i32, %c0_i32_0 : i32, i32
  }
  func.func @transform_2(%arg0: i32) -> (i32, i32) {
    %c0_i32 = arith.constant 0 : i32
    %c0_i32_0 = arith.constant 0 : i32
    %c0_i32_1 = arith.constant 0 : i32
    return %c0_i32, %c0_i32_0 : i32, i32
  }
  func.func @transform_3(%arg0: i32) -> (i32, i32) {
    %c0_i32 = arith.constant 0 : i32
    %c0_i32_0 = arith.constant 0 : i32
    return %arg0, %c0_i32 : i32, i32
  }
}

</mosaic_0001>

<bundles_post_ra>
// kernel: tpu_custom_call.1
= control target key start
LH: loop header
LB: loop body
LE: loop exit
PB: predicated region body
PF: predicated region fallthrough
CT: control target
= control target key end

     0   :  { %vm260_vm0 = vcmask 523264   ;;  %s919_s0 = inlined_call_operand.vmem [shape: bf16[128,192], index: 0, kind: input, shape index: {}]   ;;  %s920_s1 = inlined_call_operand.vmem [shape: bf16[192,256], index: 1, kind: input, shape index: {}]   ;;  %s921_s2 = inlined_call_operand.vmem [shape: f32[1,256], index: 2, kind: input, shape index: {}]   ;;  %s922_s3 = inlined_call_operand.hbm [shape: bf16[128,256], index: 3, kind: output, shape index: {}]  }
   0x1   :  { %v633_v0 = vld [vmem:[%s920_s1 + $0x4] ss:$8 sps:$4 sm:$0xff]   ;;  %v635_v1 = vld [vmem:[%s920_s1] ss:$8 sps:$4 sm:$0xff]   ;;  %v636_v2 = vld [vmem:[%s920_s1 + $0x14] ss:$8 sps:$4 sm:$0xff]  }
   0x2   :  { %285 = vmatprep.subr.bf16.mxu0 %v633_v0  ;;  %606 = vmatprep.subr.bf16.mxu1 %v633_v0  ;;  %v638_v3 = vld [vmem:[%s920_s1 + $0x10] ss:$8 sps:$4 sm:$0xff]   ;;  %v639_v4 = vld [vmem:[%s920_s1 + $0x24] ss:$8 sps:$4 sm:$0xff]   ;;  %v641_v5 = vld [vmem:[%s920_s1 + $0x20] ss:$8 sps:$4 sm:$0xff]  }
   0x3   :  { %286 = vmatpush1.bf16.msra.mxu0 %v635_v1  ;;  %618 = vmatpush1.bf16.msra.mxu1 %v635_v1  ;;  %v642_v6 = vld [vmem:[%s920_s1 + $0x34] ss:$8 sps:$4 sm:$0xff]   ;;  %v644_v7 = vld [vmem:[%s920_s1 + $0x30] ss:$8 sps:$4 sm:$0xff]   ;;  %v645_v8 = vld [vmem:[%s920_s1 + $0x44] ss:$8 sps:$4 sm:$0xff]  }
   0x4   :  { %287 = vmatprep.subr.bf16.mxu0 %v636_v2  ;;  %607 = vmatprep.subr.bf16.mxu1 %v636_v2  ;;  %v647_v9 = vld [vmem:[%s920_s1 + $0x40] ss:$8 sps:$4 sm:$0xff]   ;;  %v648_v10 = vld [vmem:[%s920_s1 + $0x54] ss:$8 sps:$4 sm:$0xff]   ;;  %v671_v11 = vld [vmem:[%s919_s0 + $0x4] ss:$8 sps:$4 sm:$0xff]  }
   0x5   :  { %v674_v12 = vld [vmem:[%s919_s0 + $0x44] ss:$8 sps:$4 sm:$0xff]   ;;  %v650_v13 = vld [vmem:[%s920_s1 + $0x50] ss:$8 sps:$4 sm:$0xff]   ;;  %566 = vmatprep.mubr.msk.bf16.mxu0 %vm260_vm0, %v671_v11  ;;  %v653_v15 = vld [vmem:[%s920_s1 + $0x60] ss:$8 sps:$4 sm:$0xff]  }
   0x6   :  { %v651_v14 = vld [vmem:[%s920_s1 + $0x64] ss:$8 sps:$4 sm:$0xff]   ;;  %570 = vmatprep.mubr.msk.bf16.mxu1 %vm260_vm0, %v674_v12  ;;  %v654_v16 = vld [vmem:[%s920_s1 + $0x74] ss:$8 sps:$4 sm:$0xff]   ;;  %v656_v17 = vld [vmem:[%s920_s1 + $0x70] ss:$8 sps:$4 sm:$0xff]  }
   0x7   :  { %288 = vmatpush1.bf16.msra.mxu0 %v638_v3  ;;  %619 = vmatpush1.bf16.msra.mxu1 %v638_v3 }
   0x8   :  { %289 = vmatprep.subr.bf16.mxu0 %v639_v4  ;;  %608 = vmatprep.subr.bf16.mxu1 %v639_v4 }
   0xb   :  { %290 = vmatpush1.bf16.msra.mxu0 %v641_v5  ;;  %620 = vmatpush1.bf16.msra.mxu1 %v641_v5 }
   0xc   :  { %291 = vmatprep.subr.bf16.mxu0 %v642_v6  ;;  %609 = vmatprep.subr.bf16.mxu1 %v642_v6 }
   0xf   :  { %292 = vmatpush1.bf16.msra.mxu0 %v644_v7  ;;  %621 = vmatpush1.bf16.msra.mxu1 %v644_v7 }
  0x10   :  { %293 = vmatprep.subr.bf16.mxu0 %v645_v8  ;;  %610 = vmatprep.subr.bf16.mxu1 %v645_v8 }
  0x13   :  { %294 = vmatpush1.bf16.msra.mxu0 %v647_v9  ;;  %622 = vmatpush1.bf16.msra.mxu1 %v647_v9 }
  0x14   :  { %295 = vmatprep.subr.bf16.mxu0 %v648_v10  ;;  %611 = vmatprep.subr.bf16.mxu1 %v648_v10 }
  0x17   :  { %296 = vmatpush1.bf16.msra.mxu0 %v650_v13  ;;  %623 = vmatpush1.bf16.msra.mxu1 %v650_v13 }
  0x18   :  { %297 = vmatprep.subr.bf16.mxu0 %v651_v14  ;;  %612 = vmatprep.subr.bf16.mxu1 %v651_v14 }
  0x1b   :  { %298 = vmatpush1.bf16.msra.mxu0 %v653_v15  ;;  %624 = vmatpush1.bf16.msra.mxu1 %v653_v15 }
  0x1c   :  { %8 = vsyncpa [#allocation3], 0  ;;  %299 = vmatprep.subr.bf16.mxu0 %v654_v16  ;;  %613 = vmatprep.subr.bf16.mxu1 %v654_v16  ;;  %v657_v18 = vld [vmem:[%s920_s1 + $0x84] ss:$8 sps:$4 sm:$0xff]   ;;  %v659_v19 = vld [vmem:[%s920_s1 + $0x80] ss:$8 sps:$4 sm:$0xff]   ;;  %v58_v40 = vlaneseq }
  0x1d   :  { %v660_v20 = vld [vmem:[%s920_s1 + $0x94] ss:$8 sps:$4 sm:$0xff]   ;;  %v662_v21 = vld [vmem:[%s920_s1 + $0x90] ss:$8 sps:$4 sm:$0xff]   ;;  %v663_v22 = vld [vmem:[%s920_s1 + $0xa4] ss:$8 sps:$4 sm:$0xff]  }
  0x1e   :  { %v665_v23 = vld [vmem:[%s920_s1 + $0xa0] ss:$8 sps:$4 sm:$0xff]   ;;  %v666_v24 = vld [vmem:[%s920_s1 + $0xb4] ss:$8 sps:$4 sm:$0xff]   ;;  %v668_v25 = vld [vmem:[%s920_s1 + $0xb0] ss:$8 sps:$4 sm:$0xff]  }
  0x1f   :  { %300 = vmatpush1.bf16.msra.mxu0 %v656_v17  ;;  %625 = vmatpush1.bf16.msra.mxu1 %v656_v17  ;;  %v669_v26 = vld [vmem:[%s919_s0] ss:$8 sps:$4 sm:$0xff]   ;;  %v675_v28 = vld [vmem:[%s919_s0 + $0x14] ss:$8 sps:$4 sm:$0xff]   ;;  %v679_v30 = vld [vmem:[%s919_s0 + $0x10] ss:$8 sps:$4 sm:$0xff]  }
  0x20   :  { %301 = vmatprep.subr.bf16.mxu0 %v657_v18  ;;  %614 = vmatprep.subr.bf16.mxu1 %v657_v18  ;;  %v672_v27 = vld [vmem:[%s919_s0 + $0x40] ss:$8 sps:$4 sm:$0xff]   ;;  %v677_v29 = vld [vmem:[%s919_s0 + $0x54] ss:$8 sps:$4 sm:$0xff]   ;;  %v680_v31 = vld [vmem:[%s919_s0 + $0x50] ss:$8 sps:$4 sm:$0xff]  }
  0x21   :  { %v681_v32 = vld [vmem:[%s919_s0 + $0x24] ss:$8 sps:$4 sm:$0xff]   ;;  %v685_v34 = vld [vmem:[%s919_s0 + $0x20] ss:$8 sps:$4 sm:$0xff]   ;;  %v687_v36 = vld [vmem:[%s919_s0 + $0x34] ss:$8 sps:$4 sm:$0xff]  }
  0x22   :  { %v683_v33 = vld [vmem:[%s919_s0 + $0x64] ss:$8 sps:$4 sm:$0xff]   ;;  %v686_v35 = vld [vmem:[%s919_s0 + $0x60] ss:$8 sps:$4 sm:$0xff]   ;;  %v689_v37 = vld [vmem:[%s919_s0 + $0x74] ss:$8 sps:$4 sm:$0xff]  }
  0x23   :  { %302 = vmatpush1.bf16.msra.mxu0 %v659_v19  ;;  %626 = vmatpush1.bf16.msra.mxu1 %v659_v19  ;;  %v691_v38 = vld [vmem:[%s919_s0 + $0x30] ss:$8 sps:$4 sm:$0xff]   ;;  %v59_v41 = vshrl.u32 %v58_v40, 7  ;;  %v56_v43 = vld [vmem:[%s921_s2] sm:$0x3] }
  0x24   :  { %303 = vmatprep.subr.bf16.mxu0 %v660_v20  ;;  %615 = vmatprep.subr.bf16.mxu1 %v660_v20  ;;  %v692_v39 = vld [vmem:[%s919_s0 + $0x70] ss:$8 sps:$4 sm:$0xff]   ;;  %s717_s0 = smov [#allocation2]  }
  0x25   :  { %v60_v42 = vsub.s32 0, %v59_v41  ;;  %v64_v44 = vsub.s32 1, %v59_v41  ;;  %s515_s2 = sshll.u32 %s717_s0, 4  ;;  %s516_s2 = int_to_ptr.vmem [resolvable:$true] %s515_s2 }
  0x26   :  { %s693_s12 = scalar_lea.vmem %s516_s2, 2048  ;;  %p698_p1 = scmp.lt.s32.totalorder %s516_s2, %s516_s2 }
  0x27   :  { %304 = vmatpush1.bf16.msra.mxu0 %v662_v21  ;;  %627 = vmatpush1.bf16.msra.mxu1 %v662_v21  ;;  %v871_v45 = vrot.slane %v56_v43, %v60_v42  ;;  %v873_v46 = vrot.slane %v56_v43, %v64_v44  ;;  %p694_p0 = scmp.ne.s32.totalorder %s516_s2, %s693_s12  ;;  %p699_p2 = scmp.lt.s32.totalorder %s693_s12, %s693_s12 }
  0x28   :  { %305 = vmatprep.subr.bf16.mxu0 %v663_v22  ;;  %616 = vmatprep.subr.bf16.mxu1 %v663_v22 }
  0x29   :  { %p700_p3 = por %p699_p2, %p698_p1 }
  0x2b   :  { %306 = vmatpush1.bf16.msra.mxu0 %v665_v23  ;;  %628 = vmatpush1.bf16.msra.mxu1 %v665_v23  ;;  %p701_p4 = pnand %p700_p3, %p694_p0 }
  0x2c   :  { %307 = vmatprep.subr.bf16.mxu0 %v666_v24  ;;  %617 = vmatprep.subr.bf16.mxu1 %v666_v24 }
  0x2f   :  { %308 = vmatpush1.bf16.msra.mxu0 %v668_v25  ;;  %629 = vmatpush1.bf16.msra.mxu1 %v668_v25 }
  0x32   :  { %318 = vmatmul.mubr.bf16.vlgmr.msra.gmra.mrb[0].mxu0 %v669_v26  ;;  %358 = vmatmul.mubr.bf16.vlgmr.msra.gmra.mrb[0].mxu1 %v672_v27 }
  0x33   :  { %567 = vmatprep.mubr.msk.bf16.mxu0 %vm260_vm0, %v675_v28  ;;  %571 = vmatprep.mubr.msk.bf16.mxu1 %vm260_vm0, %v677_v29 }
  0x3a   :  { %328 = vmatmul.mubr.bf16.gmra.mrb[4].mxu0 %v679_v30  ;;  %368 = vmatmul.mubr.bf16.gmra.mrb[4].mxu1 %v680_v31 }
  0x3b   :  { %568 = vmatprep.mubr.msk.bf16.mxu0 %vm260_vm0, %v681_v32  ;;  %572 = vmatprep.mubr.msk.bf16.mxu1 %vm260_vm0, %v683_v33 }
  0x42   :  { %338 = vmatmul.mubr.bf16.gmra.mrb[8].mxu0 %v685_v34  ;;  %378 = vmatmul.mubr.bf16.gmra.mrb[8].mxu1 %v686_v35 }
  0x43   :  { %569 = vmatprep.mubr.msk.bf16.mxu0 %vm260_vm0, %v687_v36  ;;  %573 = vmatprep.mubr.msk.bf16.mxu1 %vm260_vm0, %v689_v37 }
  0x4a   :  { %348 = vmatmul.mubr.bf16.gmra.mrb[12].mxu0 %v691_v38  ;;  %388 = vmatmul.mubr.bf16.gmra.mrb[12].mxu1 %v692_v39 }
 0x105   :  { %v319_v47 = vpop.f32.mrb[0].mxu0  ;;  %v359_v48 = vpop.f32.mrb[0].mxu1 }
 0x106   :  { %v320_v49 = vadd.f32 %v319_v47, %v871_v45  ;;  %v360_v50 = vadd.f32 %v359_v48, %v871_v45  ;;  %v321_v51 = vpop.f32.mrb[1].mxu0  ;;  %v361_v52 = vpop.f32.mrb[1].mxu1 }
 0x107   :  { %v322_v53 = vadd.f32 %v321_v51, %v873_v46  ;;  %v362_v54 = vadd.f32 %v361_v52, %v873_v46  ;;  %v323_v55 = vpop.f32.mrb[2].mxu0  ;;  %v363_v56 = vpop.f32.mrb[2].mxu1 }
 0x108   :  { %v324_v57 = vadd.f32 %v323_v55, %v871_v45  ;;  %v364_v58 = vadd.f32 %v363_v56, %v871_v45  ;;  %v325_v59 = vpop.f32.mrb[3].mxu0  ;;  %v365_v60 = vpop.f32.mrb[3].mxu1 }
 0x109   :  { %v590_v61 = vpack.c.bf16 %v322_v53, %v320_v49  ;;  %v598_v62 = vpack.c.bf16 %v362_v54, %v360_v50  ;;  %v326_v63 = vadd.f32 %v325_v59, %v873_v46  ;;  %v366_v0 = vadd.f32 %v365_v60, %v873_v46 }
 0x10b   :  { %494 = vst [vmem:[#allocation2] sm:$0xff] %v590_v61  ;;  %502 = vst [vmem:[#allocation2 + $0x40] sm:$0xff] %v598_v62  ;;  %v591_v1 = vpack.c.bf16 %v326_v63, %v324_v57  ;;  %v599_v2 = vpack.c.bf16 %v366_v0, %v364_v58 }
 0x10d   :  { %495 = vst [vmem:[#allocation2 + $0x8] sm:$0xff] %v591_v1  ;;  %503 = vst [vmem:[#allocation2 + $0x48] sm:$0xff] %v599_v2  ;;  %v329_v3 = vpop.f32.mrb[4].mxu0  ;;  %v369_v4 = vpop.f32.mrb[4].mxu1 }
 0x10e   :  { %v330_v5 = vadd.f32 %v329_v3, %v871_v45  ;;  %v370_v6 = vadd.f32 %v369_v4, %v871_v45  ;;  %v331_v7 = vpop.f32.mrb[5].mxu0  ;;  %v371_v8 = vpop.f32.mrb[5].mxu1 }
 0x10f   :  { %v332_v9 = vadd.f32 %v331_v7, %v873_v46  ;;  %v372_v10 = vadd.f32 %v371_v8, %v873_v46  ;;  %v333_v11 = vpop.f32.mrb[6].mxu0  ;;  %v373_v12 = vpop.f32.mrb[6].mxu1 }
 0x110   :  { %v334_v13 = vadd.f32 %v333_v11, %v871_v45  ;;  %v374_v14 = vadd.f32 %v373_v12, %v871_v45  ;;  %v335_v15 = vpop.f32.mrb[7].mxu0  ;;  %v375_v16 = vpop.f32.mrb[7].mxu1 }
 0x111   :  { %v592_v17 = vpack.c.bf16 %v332_v9, %v330_v5  ;;  %v600_v18 = vpack.c.bf16 %v372_v10, %v370_v6  ;;  %v336_v19 = vadd.f32 %v335_v15, %v873_v46  ;;  %v376_v20 = vadd.f32 %v375_v16, %v873_v46 }
 0x113   :  { %496 = vst [vmem:[#allocation2 + $0x10] sm:$0xff] %v592_v17  ;;  %504 = vst [vmem:[#allocation2 + $0x50] sm:$0xff] %v600_v18  ;;  %v593_v21 = vpack.c.bf16 %v336_v19, %v334_v13  ;;  %v601_v22 = vpack.c.bf16 %v376_v20, %v374_v14 }
 0x115   :  { %497 = vst [vmem:[#allocation2 + $0x18] sm:$0xff] %v593_v21  ;;  %505 = vst [vmem:[#allocation2 + $0x58] sm:$0xff] %v601_v22  ;;  %v339_v23 = vpop.f32.mrb[8].mxu0  ;;  %v379_v24 = vpop.f32.mrb[8].mxu1 }
 0x116   :  { %v340_v25 = vadd.f32 %v339_v23, %v871_v45  ;;  %v380_v26 = vadd.f32 %v379_v24, %v871_v45  ;;  %v341_v27 = vpop.f32.mrb[9].mxu0  ;;  %v381_v28 = vpop.f32.mrb[9].mxu1 }
 0x117   :  { %v342_v29 = vadd.f32 %v341_v27, %v873_v46  ;;  %v382_v30 = vadd.f32 %v381_v28, %v873_v46  ;;  %v343_v31 = vpop.f32.mrb[10].mxu0  ;;  %v383_v32 = vpop.f32.mrb[10].mxu1 }
 0x118   :  { %v344_v33 = vadd.f32 %v343_v31, %v871_v45  ;;  %v384_v34 = vadd.f32 %v383_v32, %v871_v45  ;;  %v345_v35 = vpop.f32.mrb[11].mxu0  ;;  %v385_v36 = vpop.f32.mrb[11].mxu1 }
 0x119   :  { %v594_v37 = vpack.c.bf16 %v342_v29, %v340_v25  ;;  %v602_v38 = vpack.c.bf16 %v382_v30, %v380_v26  ;;  %v346_v39 = vadd.f32 %v345_v35, %v873_v46  ;;  %v386_v40 = vadd.f32 %v385_v36, %v873_v46 }
 0x11b   :  { %498 = vst [vmem:[#allocation2 + $0x20] sm:$0xff] %v594_v37  ;;  %506 = vst [vmem:[#allocation2 + $0x60] sm:$0xff] %v602_v38  ;;  %v595_v41 = vpack.c.bf16 %v346_v39, %v344_v33  ;;  %v603_v42 = vpack.c.bf16 %v386_v40, %v384_v34 }
 0x11d   :  { %499 = vst [vmem:[#allocation2 + $0x28] sm:$0xff] %v595_v41  ;;  %507 = vst [vmem:[#allocation2 + $0x68] sm:$0xff] %v603_v42  ;;  %v349_v43 = vpop.f32.mrb[12].mxu0  ;;  %v389_v44 = vpop.f32.mrb[12].mxu1 }
 0x11e   :  { %v350_v47 = vadd.f32 %v349_v43, %v871_v45  ;;  %v390_v48 = vadd.f32 %v389_v44, %v871_v45  ;;  %v351_v49 = vpop.f32.mrb[13].mxu0  ;;  %v391_v50 = vpop.f32.mrb[13].mxu1 }
 0x11f   :  { %v352_v51 = vadd.f32 %v351_v49, %v873_v46  ;;  %v392_v52 = vadd.f32 %v391_v50, %v873_v46  ;;  %v353_v53 = vpop.f32.mrb[14].mxu0  ;;  %v393_v54 = vpop.f32.mrb[14].mxu1 }
 0x120   :  { %v354_v55 = vadd.f32 %v353_v53, %v871_v45  ;;  %v394_v56 = vadd.f32 %v393_v54, %v871_v45  ;;  %v355_v57 = vpop.f32.mrb[15].mxu0  ;;  %v395_v58 = vpop.f32.mrb[15].mxu1 }
 0x121   :  { %v596_v59 = vpack.c.bf16 %v352_v51, %v350_v47  ;;  %v604_v60 = vpack.c.bf16 %v392_v52, %v390_v48  ;;  %v356_v61 = vadd.f32 %v355_v57, %v873_v46  ;;  %v396_v62 = vadd.f32 %v395_v58, %v873_v46 }
 0x123   :  { %500 = vst [vmem:[#allocation2 + $0x30] sm:$0xff] %v596_v59  ;;  %508 = vst [vmem:[#allocation2 + $0x70] sm:$0xff] %v604_v60  ;;  %v597_v63 = vpack.c.bf16 %v356_v61, %v354_v55  ;;  %v605_v0 = vpack.c.bf16 %v396_v62, %v394_v56 }
 0x125   :  { %501 = vst [vmem:[#allocation2 + $0x38] sm:$0xff] %v597_v63  ;;  %509 = vst [vmem:[#allocation2 + $0x78] sm:$0xff] %v605_v0 }
 0x126   :  { %704 = shalt.err (!%p701_p4)
}
 0x127   :  { %s705_s15 = scalar_lea.hbm %s922_s3, 2048 }
 0x128   :  { %p706_p5 = scmp.ne.s32.totalorder %s922_s3, %s705_s15  ;;  %p709_p6 = scmp.lt.u32.totalorder %s705_s15, %s922_s3 }
 0x12a   :  { %p711_p7 = pnand %p709_p6, %p706_p5 }
 0x12c   :  { %714 = shalt.err (!%p711_p7)
}
 0x12d   :  { %s718_s19 = smov 128   ;;  %s719_s20 = smov 8  }
 0x12e   :  { %521 = dma.vmem_to_hbm [thread:$0]  %s516_s2, 2048, %s922_s3, [#allocation3], %s718_s19, %s718_s19, %s719_s20  }
 0x12f   :  { %715 = dma.done.wait [#allocation3], 2048  }
 0x130   :  { %716 = vsyncadd [#allocation3], 4294965248 }
 0x131   :  { %525 = vsyncpa [#allocation3], 1 }

</bundles_post_ra>
